<compile_context>
chip_gen: v5e
topology: v5e:2x2
jax: 0.10.0
libtpu: 0.0.40
codegen_flags: <defaults>
</compile_context>

<pallas_src>
import functools

import jax
import jax.numpy as jnp
from jax import lax
from jax.experimental import pallas as pl
from jax.experimental.pallas import tpu as pltpu


def _self_attention_kernel(q_ref, k_ref, v_ref,
                           wq_ref, wk_ref, wv_ref,
                           wo_ref, bo_ref,
                           out_ref, concat_ref,
                           *, heads, head_dim, scale):
    """One grid step = one q-row tile; all heads handled in this single step.

    q_ref:  [tq, E]   bf16        k_ref / v_ref: [Sk, E] bf16
    w*_ref: [E, E]    bf16  (already transposed so y = x @ w)
    bo_ref: [1, E]    f32
    out_ref:[tq, E]   f32
    concat_ref: [tq, E] f32 VMEM scratch holding per-head outputs side by side.
    """
    # Fused projections: full-width bf16 MXU matmuls, f32 accumulation.
    q_all = jnp.dot(q_ref[...], wq_ref[...], preferred_element_type=jnp.float32)
    k_all = jnp.dot(k_ref[...], wk_ref[...], preferred_element_type=jnp.float32)
    v_all = jnp.dot(v_ref[...], wv_ref[...], preferred_element_type=jnp.float32)

    # Fold the 1/sqrt(embed_size) softmax scale into Q once (cheap VPU pass).
    q_all = q_all * scale

    # Per-head attention, statically unrolled (heads is a small Python constant).
    for h in range(heads):
        lo = h * head_dim
        q_h = q_all[:, lo:lo + head_dim].astype(jnp.bfloat16)
        k_h = k_all[:, lo:lo + head_dim].astype(jnp.bfloat16)
        v_h = v_all[:, lo:lo + head_dim].astype(jnp.bfloat16)

        # energy[q, k] = <q_h[q], k_h[k]>; contract last dims of both operands
        # (no explicit transpose of K).
        energy = lax.dot_general(
            q_h, k_h,
            dimension_numbers=(((1,), (1,)), ((), ())),
            preferred_element_type=jnp.float32)                     # [tq, Sk] f32

        # Numerically stable softmax over k (f32 math, EUP approx reciprocal).
        energy = energy - jnp.max(energy, axis=-1, keepdims=True)
        p = jnp.exp(energy)
        attn = p * pl.reciprocal(jnp.sum(p, axis=-1, keepdims=True), approx=True)

        # [tq, Sk] @ [Sk, hd] -> [tq, hd]; write into this head's column block.
        head_out = jnp.dot(attn.astype(jnp.bfloat16), v_h,
                           preferred_element_type=jnp.float32)
        concat_ref[:, lo:lo + head_dim] = head_out

    # One full-contraction fc_out matmul + bias; single lane-dense output store.
    out = jnp.dot(concat_ref[...].astype(jnp.bfloat16), wo_ref[...],
                  preferred_element_type=jnp.float32)
    out_ref[...] = out + bo_ref[...]


def self_attention_pallas(values, keys, query, params, *, embed_size, heads,
                          q_tile=None):
    """values/keys/query: [seq, embed] float32.  Returns [q_len, embed] float32."""
    head_dim = embed_size // heads
    assert head_dim * heads == embed_size, "embed_size must be divisible by heads"

    Wv, Wk, Wq, Wo, bo = (params["Wv"], params["Wk"], params["Wq"],
                          params["Wo"], params["bo"])

    # PyTorch Linear computes y = x @ W^T, so hand the kernel W^T directly.
    # Matmul operands are cast to bf16 (MXU-native); bias / accumulation stay f32.
    wq = Wq.T.astype(jnp.bfloat16)
    wk = Wk.T.astype(jnp.bfloat16)
    wv = Wv.T.astype(jnp.bfloat16)
    wo = Wo.T.astype(jnp.bfloat16)
    bo_2d = bo.reshape(1, embed_size).astype(jnp.float32)

    q_bf = query.astype(jnp.bfloat16)
    k_bf = keys.astype(jnp.bfloat16)
    v_bf = values.astype(jnp.bfloat16)

    q_len = query.shape[0]
    k_len = keys.shape[0]
    v_len = values.shape[0]
    assert v_len == k_len, "key/value lengths must match"

    # Tile only the independent q axis (marked "parallel" for v7x megacore);
    # K/V and all weights stay resident across q tiles.
    tq = q_len if q_tile is None else min(q_tile, q_len)
    assert q_len % tq == 0, "q_len must be divisible by the q tile size"
    grid = (q_len // tq,)

    scale = 1.0 / float(embed_size) ** 0.5
    kernel = functools.partial(_self_attention_kernel,
                               heads=heads, head_dim=head_dim, scale=scale)

    grid_spec = pltpu.PrefetchScalarGridSpec(
        num_scalar_prefetch=0,
        grid=grid,
        in_specs=[
            pl.BlockSpec((tq, embed_size), lambda i: (i, 0)),           # query tile
            pl.BlockSpec((k_len, embed_size), lambda i: (0, 0)),        # keys (resident)
            pl.BlockSpec((v_len, embed_size), lambda i: (0, 0)),        # values (resident)
            pl.BlockSpec((embed_size, embed_size), lambda i: (0, 0)),   # Wq^T
            pl.BlockSpec((embed_size, embed_size), lambda i: (0, 0)),   # Wk^T
            pl.BlockSpec((embed_size, embed_size), lambda i: (0, 0)),   # Wv^T
            pl.BlockSpec((embed_size, embed_size), lambda i: (0, 0)),   # Wo^T
            pl.BlockSpec((1, embed_size), lambda i: (0, 0)),            # fc_out bias
        ],
        out_specs=pl.BlockSpec((tq, embed_size), lambda i: (i, 0)),
        scratch_shapes=[pltpu.VMEM((tq, embed_size), jnp.float32)],     # head concat
    )

    return pl.pallas_call(
        kernel,
        out_shape=jax.ShapeDtypeStruct((q_len, embed_size), jnp.float32),
        grid_spec=grid_spec,
        compiler_params=pltpu.CompilerParams(
            dimension_semantics=("parallel",),
            vmem_limit_bytes=64 * 1024 * 1024),
    )(q_bf, k_bf, v_bf, wq, wk, wv, wo, bo_2d)


def self_attention_ref(values, keys, query, params, *, embed_size, heads):
    """Plain-JAX f32 reference mirroring the PyTorch forward exactly."""
    head_dim = embed_size // heads
    Wv, Wk, Wq, Wo, bo = (params["Wv"], params["Wk"], params["Wq"],
                          params["Wo"], params["bo"])
    v = values @ Wv.T
    k = keys @ Wk.T
    q = query @ Wq.T
    v = v.reshape(values.shape[0], heads, head_dim)
    k = k.reshape(keys.shape[0], heads, head_dim)
    q = q.reshape(query.shape[0], heads, head_dim)
    energy = jnp.einsum("qhd,khd->hqk", q, k)
    attention = jax.nn.softmax(energy / (embed_size ** 0.5), axis=2)
    out = jnp.einsum("hql,lhd->qhd", attention, v).reshape(
        query.shape[0], heads * head_dim)
    return out @ Wo.T + bo


if __name__ == "__main__":
    # Lane-dense embed (multiple of 128) per the perf guidance; still a small toy size.
    embed_size = 128
    heads = 4
    seq_len = 8

    key = jax.random.PRNGKey(0)
    k_v, k_k, k_q, k_wv, k_wk, k_wq, k_wo, k_bo = jax.random.split(key, 8)

    values = jax.random.normal(k_v, (seq_len, embed_size), dtype=jnp.float32)
    keys_in = jax.random.normal(k_k, (seq_len, embed_size), dtype=jnp.float32)
    query = jax.random.normal(k_q, (seq_len, embed_size), dtype=jnp.float32)

    bound = 1.0 / (embed_size ** 0.5)
    params = {
        "Wv": jax.random.uniform(k_wv, (embed_size, embed_size), jnp.float32, -bound, bound),
        "Wk": jax.random.uniform(k_wk, (embed_size, embed_size), jnp.float32, -bound, bound),
        "Wq": jax.random.uniform(k_wq, (embed_size, embed_size), jnp.float32, -bound, bound),
        "Wo": jax.random.uniform(k_wo, (embed_size, embed_size), jnp.float32, -bound, bound),
        "bo": jax.random.uniform(k_bo, (embed_size,), jnp.float32, -bound, bound),
    }

    out = self_attention_pallas(values, keys_in, query, params,
                                embed_size=embed_size, heads=heads)
    out = jax.block_until_ready(out)

    ref = self_attention_ref(values, keys_in, query, params,
                             embed_size=embed_size, heads=heads)
    assert out.shape == (seq_len, embed_size)
    max_err = float(jnp.max(jnp.abs(out - ref)))
    # bf16 matmul operands -> loosen tolerance vs the pure-f32 reference.
    assert jnp.allclose(out, ref, atol=5e-2, rtol=5e-2), \
        f"Pallas output mismatch vs reference (max abs err {max_err})"

    print("KERNEL_OK")
</pallas_src>

<mosaic_0001>
module attributes {stable_mosaic.version = 11 : i64} {
  func.func @_self_attention_kernel(%arg0: i32, %arg1: memref<8x128xbf16, #tpu.memory_space<vmem>>, %arg2: memref<8x128xbf16, #tpu.memory_space<vmem>>, %arg3: memref<8x128xbf16, #tpu.memory_space<vmem>>, %arg4: memref<128x128xbf16, #tpu.memory_space<vmem>>, %arg5: memref<128x128xbf16, #tpu.memory_space<vmem>>, %arg6: memref<128x128xbf16, #tpu.memory_space<vmem>>, %arg7: memref<128x128xbf16, #tpu.memory_space<vmem>>, %arg8: memref<1x128xf32, #tpu.memory_space<vmem>>, %arg9: memref<8x128xf32, #tpu.memory_space<vmem>>, %arg10: memref<8x128xf32, #tpu.memory_space<vmem>>) attributes {dimension_semantics = [#tpu.dimension_semantics<parallel>], iteration_bounds = array<i64: 1>, scalar_prefetch = 0 : i64, scratch_operands = 1 : i64, tpu.core_type = #tpu.core_type<tc>, window_params = [{transform_indices = @transform_0, window_bounds = array<i64: 8, 128>}, {pipeline_mode = #tpu.pipeline_mode<synchronous>, transform_indices = @transform_1, window_bounds = array<i64: 8, 128>}, {pipeline_mode = #tpu.pipeline_mode<synchronous>, transform_indices = @transform_2, window_bounds = array<i64: 8, 128>}, {pipeline_mode = #tpu.pipeline_mode<synchronous>, transform_indices = @transform_3, window_bounds = array<i64: 128, 128>}, {pipeline_mode = #tpu.pipeline_mode<synchronous>, transform_indices = @transform_4, window_bounds = array<i64: 128, 128>}, {pipeline_mode = #tpu.pipeline_mode<synchronous>, transform_indices = @transform_5, window_bounds = array<i64: 128, 128>}, {pipeline_mode = #tpu.pipeline_mode<synchronous>, transform_indices = @transform_6, window_bounds = array<i64: 128, 128>}, {pipeline_mode = #tpu.pipeline_mode<synchronous>, transform_indices = @transform_7, window_bounds = array<i64: 1, 128>}, {transform_indices = @transform_8, window_bounds = array<i64: 8, 128>}]} {
    %c0 = arith.constant 0 : index
    %c0_0 = arith.constant 0 : index
    %0 = vector.load %arg1[%c0, %c0_0] : memref<8x128xbf16, #tpu.memory_space<vmem>>, vector<8x128xbf16>
    %c0_1 = arith.constant 0 : index
    %c0_2 = arith.constant 0 : index
    %1 = vector.load %arg4[%c0_1, %c0_2] : memref<128x128xbf16, #tpu.memory_space<vmem>>, vector<128x128xbf16>
    %cst = arith.constant dense<0.000000e+00> : vector<8x128xf32>
    %2 = tpu.matmul %0, %1, %cst {dimension_numbers = #tpu.dot_dimension_numbers<[1], [0], [0], [1], [0, 0, 1, 1], [], []>} : vector<8x128xbf16>, vector<128x128xbf16>, vector<8x128xf32> -> vector<8x128xf32>
    %c0_3 = arith.constant 0 : index
    %c0_4 = arith.constant 0 : index
    %3 = vector.load %arg2[%c0_3, %c0_4] : memref<8x128xbf16, #tpu.memory_space<vmem>>, vector<8x128xbf16>
    %c0_5 = arith.constant 0 : index
    %c0_6 = arith.constant 0 : index
    %4 = vector.load %arg5[%c0_5, %c0_6] : memref<128x128xbf16, #tpu.memory_space<vmem>>, vector<128x128xbf16>
    %cst_7 = arith.constant dense<0.000000e+00> : vector<8x128xf32>
    %5 = tpu.matmul %3, %4, %cst_7 {dimension_numbers = #tpu.dot_dimension_numbers<[1], [0], [0], [1], [0, 0, 1, 1], [], []>} : vector<8x128xbf16>, vector<128x128xbf16>, vector<8x128xf32> -> vector<8x128xf32>
    %c0_8 = arith.constant 0 : index
    %c0_9 = arith.constant 0 : index
    %6 = vector.load %arg3[%c0_8, %c0_9] : memref<8x128xbf16, #tpu.memory_space<vmem>>, vector<8x128xbf16>
    %c0_10 = arith.constant 0 : index
    %c0_11 = arith.constant 0 : index
    %7 = vector.load %arg6[%c0_10, %c0_11] : memref<128x128xbf16, #tpu.memory_space<vmem>>, vector<128x128xbf16>
    %cst_12 = arith.constant dense<0.000000e+00> : vector<8x128xf32>
    %8 = tpu.matmul %6, %7, %cst_12 {dimension_numbers = #tpu.dot_dimension_numbers<[1], [0], [0], [1], [0, 0, 1, 1], [], []>} : vector<8x128xbf16>, vector<128x128xbf16>, vector<8x128xf32> -> vector<8x128xf32>
    %cst_13 = arith.constant 0.0883883461 : f32
    %9 = vector.broadcast %cst_13 : f32 to vector<8x128xf32>
    %10 = arith.mulf %2, %9 : vector<8x128xf32>
    %11 = vector.extract_strided_slice %10 {offsets = [0, 0], sizes = [8, 32], strides = [1, 1]} : vector<8x128xf32> to vector<8x32xf32>
    %12 = arith.truncf %11 : vector<8x32xf32> to vector<8x32xbf16>
    %13 = vector.extract_strided_slice %5 {offsets = [0, 0], sizes = [8, 32], strides = [1, 1]} : vector<8x128xf32> to vector<8x32xf32>
    %14 = arith.truncf %13 : vector<8x32xf32> to vector<8x32xbf16>
    %15 = vector.extract_strided_slice %8 {offsets = [0, 0], sizes = [8, 32], strides = [1, 1]} : vector<8x128xf32> to vector<8x32xf32>
    %16 = arith.truncf %15 : vector<8x32xf32> to vector<8x32xbf16>
    %cst_14 = arith.constant dense<0.000000e+00> : vector<8x8xf32>
    %17 = tpu.matmul %12, %14, %cst_14 {dimension_numbers = #tpu.dot_dimension_numbers<[1], [1], [0], [0], [0, 0, 1, 0], [], []>} : vector<8x32xbf16>, vector<8x32xbf16>, vector<8x8xf32> -> vector<8x8xf32>
    %cst_15 = arith.constant dense<0xFF800000> : vector<8xf32>
    %18 = vector.multi_reduction <maximumf>, %17, %cst_15 [1] : vector<8x8xf32> to vector<8xf32>
    %19 = vector.shape_cast %18 : vector<8xf32> to vector<8x1xf32>
    %20 = vector.broadcast %19 : vector<8x1xf32> to vector<8x8xf32>
    %21 = arith.subf %17, %20 : vector<8x8xf32>
    %22 = math.exp %21 : vector<8x8xf32>
    %cst_16 = arith.constant dense<0.000000e+00> : vector<8xf32>
    %23 = vector.multi_reduction <add>, %22, %cst_16 [1] : vector<8x8xf32> to vector<8xf32>
    %24 = vector.shape_cast %23 : vector<8xf32> to vector<8x1xf32>
    %25 = tpu.reciprocal %24 {approx = true} : vector<8x1xf32> -> vector<8x1xf32>
    %26 = vector.broadcast %25 : vector<8x1xf32> to vector<8x8xf32>
    %27 = arith.mulf %22, %26 : vector<8x8xf32>
    %28 = arith.truncf %27 : vector<8x8xf32> to vector<8x8xbf16>
    %cst_17 = arith.constant dense<0.000000e+00> : vector<8x32xf32>
    %29 = tpu.matmul %28, %16, %cst_17 {dimension_numbers = #tpu.dot_dimension_numbers<[1], [0], [0], [1], [0, 0, 1, 1], [], []>} : vector<8x8xbf16>, vector<8x32xbf16>, vector<8x32xf32> -> vector<8x32xf32>
    %c0_18 = arith.constant 0 : index
    %c0_19 = arith.constant 0 : index
    %30 = vector.load %arg10[%c0_18, %c0_19] : memref<8x128xf32, #tpu.memory_space<vmem>>, vector<8x32xf32>
    tpu.vector_store %arg10[%c0_18, %c0_19], %29 {strides = array<i32>} : memref<8x128xf32, #tpu.memory_space<vmem>>, vector<8x32xf32>,
    %31 = vector.extract_strided_slice %10 {offsets = [0, 32], sizes = [8, 32], strides = [1, 1]} : vector<8x128xf32> to vector<8x32xf32>
    %32 = arith.truncf %31 : vector<8x32xf32> to vector<8x32xbf16>
    %33 = vector.extract_strided_slice %5 {offsets = [0, 32], sizes = [8, 32], strides = [1, 1]} : vector<8x128xf32> to vector<8x32xf32>
    %34 = arith.truncf %33 : vector<8x32xf32> to vector<8x32xbf16>
    %35 = vector.extract_strided_slice %8 {offsets = [0, 32], sizes = [8, 32], strides = [1, 1]} : vector<8x128xf32> to vector<8x32xf32>
    %36 = arith.truncf %35 : vector<8x32xf32> to vector<8x32xbf16>
    %cst_20 = arith.constant dense<0.000000e+00> : vector<8x8xf32>
    %37 = tpu.matmul %32, %34, %cst_20 {dimension_numbers = #tpu.dot_dimension_numbers<[1], [1], [0], [0], [0, 0, 1, 0], [], []>} : vector<8x32xbf16>, vector<8x32xbf16>, vector<8x8xf32> -> vector<8x8xf32>
    %cst_21 = arith.constant dense<0xFF800000> : vector<8xf32>
    %38 = vector.multi_reduction <maximumf>, %37, %cst_21 [1] : vector<8x8xf32> to vector<8xf32>
    %39 = vector.shape_cast %38 : vector<8xf32> to vector<8x1xf32>
    %40 = vector.broadcast %39 : vector<8x1xf32> to vector<8x8xf32>
    %41 = arith.subf %37, %40 : vector<8x8xf32>
    %42 = math.exp %41 : vector<8x8xf32>
    %cst_22 = arith.constant dense<0.000000e+00> : vector<8xf32>
    %43 = vector.multi_reduction <add>, %42, %cst_22 [1] : vector<8x8xf32> to vector<8xf32>
    %44 = vector.shape_cast %43 : vector<8xf32> to vector<8x1xf32>
    %45 = tpu.reciprocal %44 {approx = true} : vector<8x1xf32> -> vector<8x1xf32>
    %46 = vector.broadcast %45 : vector<8x1xf32> to vector<8x8xf32>
    %47 = arith.mulf %42, %46 : vector<8x8xf32>
    %48 = arith.truncf %47 : vector<8x8xf32> to vector<8x8xbf16>
    %cst_23 = arith.constant dense<0.000000e+00> : vector<8x32xf32>
    %49 = tpu.matmul %48, %36, %cst_23 {dimension_numbers = #tpu.dot_dimension_numbers<[1], [0], [0], [1], [0, 0, 1, 1], [], []>} : vector<8x8xbf16>, vector<8x32xbf16>, vector<8x32xf32> -> vector<8x32xf32>
    %c0_24 = arith.constant 0 : index
    %c32 = arith.constant 32 : index
    %50 = vector.load %arg10[%c0_24, %c32] : memref<8x128xf32, #tpu.memory_space<vmem>>, vector<8x32xf32>
    tpu.vector_store %arg10[%c0_24, %c32], %49 {strides = array<i32>} : memref<8x128xf32, #tpu.memory_space<vmem>>, vector<8x32xf32>,
    %51 = vector.extract_strided_slice %10 {offsets = [0, 64], sizes = [8, 32], strides = [1, 1]} : vector<8x128xf32> to vector<8x32xf32>
    %52 = arith.truncf %51 : vector<8x32xf32> to vector<8x32xbf16>
    %53 = vector.extract_strided_slice %5 {offsets = [0, 64], sizes = [8, 32], strides = [1, 1]} : vector<8x128xf32> to vector<8x32xf32>
    %54 = arith.truncf %53 : vector<8x32xf32> to vector<8x32xbf16>
    %55 = vector.extract_strided_slice %8 {offsets = [0, 64], sizes = [8, 32], strides = [1, 1]} : vector<8x128xf32> to vector<8x32xf32>
    %56 = arith.truncf %55 : vector<8x32xf32> to vector<8x32xbf16>
    %cst_25 = arith.constant dense<0.000000e+00> : vector<8x8xf32>
    %57 = tpu.matmul %52, %54, %cst_25 {dimension_numbers = #tpu.dot_dimension_numbers<[1], [1], [0], [0], [0, 0, 1, 0], [], []>} : vector<8x32xbf16>, vector<8x32xbf16>, vector<8x8xf32> -> vector<8x8xf32>
    %cst_26 = arith.constant dense<0xFF800000> : vector<8xf32>
    %58 = vector.multi_reduction <maximumf>, %57, %cst_26 [1] : vector<8x8xf32> to vector<8xf32>
    %59 = vector.shape_cast %58 : vector<8xf32> to vector<8x1xf32>
    %60 = vector.broadcast %59 : vector<8x1xf32> to vector<8x8xf32>
    %61 = arith.subf %57, %60 : vector<8x8xf32>
    %62 = math.exp %61 : vector<8x8xf32>
    %cst_27 = arith.constant dense<0.000000e+00> : vector<8xf32>
    %63 = vector.multi_reduction <add>, %62, %cst_27 [1] : vector<8x8xf32> to vector<8xf32>
    %64 = vector.shape_cast %63 : vector<8xf32> to vector<8x1xf32>
    %65 = tpu.reciprocal %64 {approx = true} : vector<8x1xf32> -> vector<8x1xf32>
    %66 = vector.broadcast %65 : vector<8x1xf32> to vector<8x8xf32>
    %67 = arith.mulf %62, %66 : vector<8x8xf32>
    %68 = arith.truncf %67 : vector<8x8xf32> to vector<8x8xbf16>
    %cst_28 = arith.constant dense<0.000000e+00> : vector<8x32xf32>
    %69 = tpu.matmul %68, %56, %cst_28 {dimension_numbers = #tpu.dot_dimension_numbers<[1], [0], [0], [1], [0, 0, 1, 1], [], []>} : vector<8x8xbf16>, vector<8x32xbf16>, vector<8x32xf32> -> vector<8x32xf32>
    %c0_29 = arith.constant 0 : index
    %c64 = arith.constant 64 : index
    %70 = vector.load %arg10[%c0_29, %c64] : memref<8x128xf32, #tpu.memory_space<vmem>>, vector<8x32xf32>
    tpu.vector_store %arg10[%c0_29, %c64], %69 {strides = array<i32>} : memref<8x128xf32, #tpu.memory_space<vmem>>, vector<8x32xf32>,
    %71 = vector.extract_strided_slice %10 {offsets = [0, 96], sizes = [8, 32], strides = [1, 1]} : vector<8x128xf32> to vector<8x32xf32>
    %72 = arith.truncf %71 : vector<8x32xf32> to vector<8x32xbf16>
    %73 = vector.extract_strided_slice %5 {offsets = [0, 96], sizes = [8, 32], strides = [1, 1]} : vector<8x128xf32> to vector<8x32xf32>
    %74 = arith.truncf %73 : vector<8x32xf32> to vector<8x32xbf16>
    %75 = vector.extract_strided_slice %8 {offsets = [0, 96], sizes = [8, 32], strides = [1, 1]} : vector<8x128xf32> to vector<8x32xf32>
    %76 = arith.truncf %75 : vector<8x32xf32> to vector<8x32xbf16>
    %cst_30 = arith.constant dense<0.000000e+00> : vector<8x8xf32>
    %77 = tpu.matmul %72, %74, %cst_30 {dimension_numbers = #tpu.dot_dimension_numbers<[1], [1], [0], [0], [0, 0, 1, 0], [], []>} : vector<8x32xbf16>, vector<8x32xbf16>, vector<8x8xf32> -> vector<8x8xf32>
    %cst_31 = arith.constant dense<0xFF800000> : vector<8xf32>
    %78 = vector.multi_reduction <maximumf>, %77, %cst_31 [1] : vector<8x8xf32> to vector<8xf32>
    %79 = vector.shape_cast %78 : vector<8xf32> to vector<8x1xf32>
    %80 = vector.broadcast %79 : vector<8x1xf32> to vector<8x8xf32>
    %81 = arith.subf %77, %80 : vector<8x8xf32>
    %82 = math.exp %81 : vector<8x8xf32>
    %cst_32 = arith.constant dense<0.000000e+00> : vector<8xf32>
    %83 = vector.multi_reduction <add>, %82, %cst_32 [1] : vector<8x8xf32> to vector<8xf32>
    %84 = vector.shape_cast %83 : vector<8xf32> to vector<8x1xf32>
    %85 = tpu.reciprocal %84 {approx = true} : vector<8x1xf32> -> vector<8x1xf32>
    %86 = vector.broadcast %85 : vector<8x1xf32> to vector<8x8xf32>
    %87 = arith.mulf %82, %86 : vector<8x8xf32>
    %88 = arith.truncf %87 : vector<8x8xf32> to vector<8x8xbf16>
    %cst_33 = arith.constant dense<0.000000e+00> : vector<8x32xf32>
    %89 = tpu.matmul %88, %76, %cst_33 {dimension_numbers = #tpu.dot_dimension_numbers<[1], [0], [0], [1], [0, 0, 1, 1], [], []>} : vector<8x8xbf16>, vector<8x32xbf16>, vector<8x32xf32> -> vector<8x32xf32>
    %c0_34 = arith.constant 0 : index
    %c96 = arith.constant 96 : index
    %90 = vector.load %arg10[%c0_34, %c96] : memref<8x128xf32, #tpu.memory_space<vmem>>, vector<8x32xf32>
    tpu.vector_store %arg10[%c0_34, %c96], %89 {strides = array<i32>} : memref<8x128xf32, #tpu.memory_space<vmem>>, vector<8x32xf32>,
    %c0_35 = arith.constant 0 : index
    %c0_36 = arith.constant 0 : index
    %91 = vector.load %arg10[%c0_35, %c0_36] : memref<8x128xf32, #tpu.memory_space<vmem>>, vector<8x128xf32>
    %92 = arith.truncf %91 : vector<8x128xf32> to vector<8x128xbf16>
    %c0_37 = arith.constant 0 : index
    %c0_38 = arith.constant 0 : index
    %93 = vector.load %arg7[%c0_37, %c0_38] : memref<128x128xbf16, #tpu.memory_space<vmem>>, vector<128x128xbf16>
    %cst_39 = arith.constant dense<0.000000e+00> : vector<8x128xf32>
    %94 = tpu.matmul %92, %93, %cst_39 {dimension_numbers = #tpu.dot_dimension_numbers<[1], [0], [0], [1], [0, 0, 1, 1], [], []>} : vector<8x128xbf16>, vector<128x128xbf16>, vector<8x128xf32> -> vector<8x128xf32>
    %c0_40 = arith.constant 0 : index
    %c0_41 = arith.constant 0 : index
    %95 = vector.load %arg8[%c0_40, %c0_41] : memref<1x128xf32, #tpu.memory_space<vmem>>, vector<1x128xf32>
    %96 = vector.broadcast %95 : vector<1x128xf32> to vector<8x128xf32>
    %97 = arith.addf %94, %96 : vector<8x128xf32>
    %c0_42 = arith.constant 0 : index
    %c0_43 = arith.constant 0 : index
    %98 = vector.load %arg9[%c0_42, %c0_43] : memref<8x128xf32, #tpu.memory_space<vmem>>, vector<8x128xf32>
    tpu.vector_store %arg9[%c0_42, %c0_43], %97 {strides = array<i32>} : memref<8x128xf32, #tpu.memory_space<vmem>>, vector<8x128xf32>,
    return
  }
  func.func @transform_0(%arg0: i32) -> (i32, i32) {
    %c0_i32 = arith.constant 0 : i32
    %c0_i32_0 = arith.constant 0 : i32
    return %arg0, %c0_i32 : i32, i32
  }
  func.func @transform_1(%arg0: i32) -> (i32, i32) {
    %c0_i32 = arith.constant 0 : i32
    %c0_i32_0 = arith.constant 0 : i32
    %c0_i32_1 = arith.constant 0 : i32
    return %c0_i32, %c0_i32_0 : i32, i32
  }
  func.func @transform_2(%arg0: i32) -> (i32, i32) {
    %c0_i32 = arith.constant 0 : i32
    %c0_i32_0 = arith.constant 0 : i32
    %c0_i32_1 = arith.constant 0 : i32
    return %c0_i32, %c0_i32_0 : i32, i32
  }
  func.func @transform_3(%arg0: i32) -> (i32, i32) {
    %c0_i32 = arith.constant 0 : i32
    %c0_i32_0 = arith.constant 0 : i32
    %c0_i32_1 = arith.constant 0 : i32
    return %c0_i32, %c0_i32_0 : i32, i32
  }
  func.func @transform_4(%arg0: i32) -> (i32, i32) {
    %c0_i32 = arith.constant 0 : i32
    %c0_i32_0 = arith.constant 0 : i32
    %c0_i32_1 = arith.constant 0 : i32
    return %c0_i32, %c0_i32_0 : i32, i32
  }
  func.func @transform_5(%arg0: i32) -> (i32, i32) {
    %c0_i32 = arith.constant 0 : i32
    %c0_i32_0 = arith.constant 0 : i32
    %c0_i32_1 = arith.constant 0 : i32
    return %c0_i32, %c0_i32_0 : i32, i32
  }
  func.func @transform_6(%arg0: i32) -> (i32, i32) {
    %c0_i32 = arith.constant 0 : i32
    %c0_i32_0 = arith.constant 0 : i32
    %c0_i32_1 = arith.constant 0 : i32
    return %c0_i32, %c0_i32_0 : i32, i32
  }
  func.func @transform_7(%arg0: i32) -> (i32, i32) {
    %c0_i32 = arith.constant 0 : i32
    %c0_i32_0 = arith.constant 0 : i32
    %c0_i32_1 = arith.constant 0 : i32
    return %c0_i32, %c0_i32_0 : i32, i32
  }
  func.func @transform_8(%arg0: i32) -> (i32, i32) {
    %c0_i32 = arith.constant 0 : i32
    %c0_i32_0 = arith.constant 0 : i32
    return %arg0, %c0_i32 : i32, i32
  }
}

</mosaic_0001>

<bundles_post_ra>
// kernel: tpu_custom_call.1
= control target key start
LH: loop header
LB: loop body
LE: loop exit
PB: predicated region body
PF: predicated region fallthrough
CT: control target
= control target key end

     0   :  { %13 = vsyncpa [#allocation4], 0  ;;  %s1257_s0 = inlined_call_operand.hbm [shape: bf16[8,128], index: 0, kind: input, shape index: {}]   ;;  %s1258_s1 = inlined_call_operand.hbm [shape: bf16[8,128], index: 1, kind: input, shape index: {}]   ;;  %s1259_s2 = inlined_call_operand.hbm [shape: bf16[8,128], index: 2, kind: input, shape index: {}]   ;;  %s1260_s3 = inlined_call_operand.hbm [shape: bf16[128,128], index: 3, kind: input, shape index: {}]   ;;  %s1261_s4 = inlined_call_operand.hbm [shape: bf16[128,128], index: 4, kind: input, shape index: {}]   ;;  %s1262_s5 = inlined_call_operand.hbm [shape: bf16[128,128], index: 5, kind: input, shape index: {}]   ;;  %s1263_s6 = inlined_call_operand.hbm [shape: bf16[128,128], index: 6, kind: input, shape index: {}]   ;;  %s1264_s7 = inlined_call_operand.vmem [shape: f32[1,128], index: 7, kind: input, shape index: {}]   ;;  %s1265_s8 = inlined_call_operand.hbm [shape: f32[8,128], index: 8, kind: output, shape index: {}]  }
   0x1   :  { %14 = vsyncpa [#allocation7], 0 }
   0x2   :  { %15 = vsyncpa [#allocation10], 0 }
   0x3   :  { %16 = vsyncpa [#allocation13], 0  ;;  %s34_s29 = sshll.u32 %s1258_s1, 4  ;;  %s35_s29 = int_to_ptr.hbm [resolvable:$true] %s34_s29 }
   0x4   :  { %17 = vsyncpa [#allocation5], 0  ;;  %s1118_s30 = smov [#allocation6]   ;;  %s55_s12 = sshll.u32 %s1260_s3, 4  ;;  %s56_s12 = int_to_ptr.hbm [resolvable:$true] %s55_s12 }
   0x5   :  { %s36_s9 = sshll.u32 %s1118_s30, 4  ;;  %s1119_s13 = smov [#allocation9]   ;;  %s37_s9 = int_to_ptr.vmem [resolvable:$true] %s36_s9 }
   0x6   :  { %39 = dma.hbm_to_vmem [thread:$0]  %s35_s29, 64, %s37_s9, [#allocation7]  }
   0x7   :  { %s57_s14 = sshll.u32 %s1119_s13, 4  ;;  %s1120_s15 = smov 64   ;;  %s58_s14 = int_to_ptr.vmem [resolvable:$true] %s57_s14 }
   0x8   :  { %s1121_s16 = smov 4   ;;  %s81_s18 = sshll.u32 %s1262_s5, 4  ;;  %s82_s18 = int_to_ptr.hbm [resolvable:$true] %s81_s18 }
   0x9   :  { %63 = dma.hbm_to_vmem [thread:$0]  %s56_s12, 1024, %s58_s14, [#allocation10], %s1120_s15, %s1120_s15, %s1121_s16  }
   0xa   :  { %s1122_s19 = smov [#allocation12]   ;;  %s23_s22 = sshll.u32 %s1257_s0, 4  ;;  %s24_s22 = int_to_ptr.hbm [resolvable:$true] %s23_s22 }
   0xb   :  { %s83_s20 = sshll.u32 %s1122_s19, 4  ;;  %s1123_s23 = smov [#allocation3]   ;;  %s84_s20 = int_to_ptr.vmem [resolvable:$true] %s83_s20 }
   0xc   :  { %89 = dma.hbm_to_vmem [thread:$0]  %s82_s18, 1024, %s84_s20, [#allocation13], %s1120_s15, %s1120_s15, %s1121_s16  }
   0xd   :  { %s25_s24 = sshll.u32 %s1123_s23, 4  ;;  %s45_s27 = sshll.u32 %s1259_s2, 4  ;;  %s26_s24 = int_to_ptr.vmem [resolvable:$true] %s25_s24  ;;  %s46_s27 = int_to_ptr.hbm [resolvable:$true] %s45_s27 }
   0xe   :  { %28 = dma.hbm_to_vmem [thread:$0]  %s24_s22, 64, %s26_s24, [#allocation4]  }
   0xf   :  { %s68_s29 = sshll.u32 %s1261_s4, 4  ;;  %s1124_s30 = smov [#allocation8]   ;;  %s69_s29 = int_to_ptr.hbm [resolvable:$true] %s68_s29 }
  0x10   :  { %s47_s0 = sshll.u32 %s1124_s30, 4  ;;  %s1125_s9 = smov [#allocation11]   ;;  %s48_s0 = int_to_ptr.vmem [resolvable:$true] %s47_s0 }
  0x11   :  { %50 = dma.hbm_to_vmem [thread:$0]  %s46_s27, 64, %s48_s0, [#allocation7]  }
  0x12   :  { %s70_s10 = sshll.u32 %s1125_s9, 4  ;;  %s94_s13 = sshll.u32 %s1263_s6, 4  ;;  %s71_s10 = int_to_ptr.vmem [resolvable:$true] %s70_s10  ;;  %s95_s13 = int_to_ptr.hbm [resolvable:$true] %s94_s13 }
  0x13   :  { %76 = dma.hbm_to_vmem [thread:$0]  %s69_s29, 1024, %s71_s10, [#allocation10], %s1120_s15, %s1120_s15, %s1121_s16  }
  0x14   :  { %s1126_s2 = smov [#allocation14]  }
  0x15   :  { %s96_s14 = sshll.u32 %s1126_s2, 4  ;;  %s97_s14 = int_to_ptr.vmem [resolvable:$true] %s96_s14 }
  0x16   :  { %102 = dma.hbm_to_vmem [thread:$0]  %s95_s13, 1024, %s97_s14, [#allocation13], %s1120_s15, %s1120_s15, %s1121_s16  }
  0x17   :  { %1108 = dma.done.wait [#allocation4], 64  }
  0x18   :  { %1109 = vsyncadd [#allocation4], 4294967232 }
  0x19   :  { %1110 = dma.done.wait [#allocation7], 128  }
  0x1a   :  { %1111 = vsyncadd [#allocation7], 4294967168 }
  0x1b   :  { %1112 = dma.done.wait [#allocation10], 2048  }
  0x1c   :  { %1113 = vsyncadd [#allocation10], 4294965248 }
  0x1d   :  { %1114 = dma.done.wait [#allocation13], 2048  }
  0x1e   :  { %1115 = vsyncadd [#allocation13], 4294965248  ;;  %v862_v0 = vld [vmem:[#allocation9 + $0x38] sm:$0xff]  ;;  %v861_v2 = vld [vmem:[#allocation9 + $0x30] sm:$0xff]  ;;  %vm372_vm0 = vcmask 261120   ;;  %s1127_s4 = smov 96  }
  0x1f   :  { %v870_v1 = vld [vmem:[#allocation11 + $0x38] sm:$0xff]  ;;  %199 = vmatpush.bf16.msra.mxu0 %v862_v0  ;;  %v869_v3 = vld [vmem:[#allocation11 + $0x30] sm:$0xff]  ;;  %v860_v4 = vld [vmem:[#allocation9 + $0x28] sm:$0xff]  ;;  %s1128_s6 = smov 32   ;;  %vm408_vm1 = vcmask 1043456   ;;  %vm392_vm2 = vcmask 64512  }
  0x20   :  { %277 = vmatpush.bf16.msra.mxu1 %v870_v1  ;;  %v868_v5 = vld [vmem:[#allocation11 + $0x28] sm:$0xff]  ;;  %v878_v6 = vld [vmem:[#allocation12 + $0x38] sm:$0xff]  ;;  %v877_v7 = vld [vmem:[#allocation12 + $0x30] sm:$0xff]  ;;  %vm489_vm3 = vcmask 523520   ;;  %vm551_vm4 = vcmask 785920   ;;  %vm613_vm5 = vcmask 1048320  }
  0x21   :  { %355 = vmatpush.bf16.msra.mxu2 %v878_v6  ;;  %v859_v8 = vld [vmem:[#allocation9 + $0x20] sm:$0xff]  ;;  %v876_v10 = vld [vmem:[#allocation12 + $0x28] sm:$0xff]  ;;  %v858_v11 = vld [vmem:[#allocation9 + $0x18] sm:$0xff]  ;;  %s1129_s1 = smov [#allocation15]   ;;  %s706_s20 = sshll.u32 %s1265_s8, 4  ;;  %s707_s20 = int_to_ptr.hbm [resolvable:$true] %s706_s20 }
  0x22   :  { %v867_v9 = vld [vmem:[#allocation11 + $0x20] sm:$0xff]  ;;  %v866_v12 = vld [vmem:[#allocation11 + $0x18] sm:$0xff]  ;;  %v857_v14 = vld [vmem:[#allocation9 + $0x10] sm:$0xff]  ;;  %s704_s17 = sshll.u32 %s1129_s1, 4  ;;  %s705_s17 = int_to_ptr.vmem [resolvable:$true] %s704_s17 }
  0x23   :  { %200 = vmatpush.bf16.msra.mxu0 %v861_v2  ;;  %v875_v13 = vld [vmem:[#allocation12 + $0x20] sm:$0xff]  ;;  %v865_v15 = vld [vmem:[#allocation11 + $0x10] sm:$0xff]  ;;  %v874_v16 = vld [vmem:[#allocation12 + $0x18] sm:$0xff] }
  0x24   :  { %278 = vmatpush.bf16.msra.mxu1 %v869_v3  ;;  %v856_v17 = vld [vmem:[#allocation9 + $0x8] sm:$0xff]  ;;  %v873_v19 = vld [vmem:[#allocation12 + $0x10] sm:$0xff]  ;;  %v855_v20 = vld [vmem:[#allocation9] sm:$0xff] }
  0x25   :  { %356 = vmatpush.bf16.msra.mxu2 %v877_v7  ;;  %v864_v18 = vld [vmem:[#allocation11 + $0x8] sm:$0xff]  ;;  %v863_v21 = vld [vmem:[#allocation11] sm:$0xff]  ;;  %v134_v23 = vld [vmem:[#allocation3] sm:$0xf] }
  0x26   :  { %v872_v22 = vld [vmem:[#allocation12 + $0x8] sm:$0xff]  ;;  %v212_v24 = vld [vmem:[#allocation6] sm:$0xf]  ;;  %v871_v25 = vld [vmem:[#allocation12] sm:$0xff] }
  0x27   :  { %201 = vmatpush.bf16.msra.mxu0 %v860_v4  ;;  %v290_v26 = vld [vmem:[#allocation8] sm:$0xf] }
  0x28   :  { %279 = vmatpush.bf16.msra.mxu1 %v868_v5 }
  0x29   :  { %357 = vmatpush.bf16.msra.mxu2 %v876_v10 }
  0x2b   :  { %202 = vmatpush.bf16.msra.mxu0 %v859_v8 }
  0x2c   :  { %280 = vmatpush.bf16.msra.mxu1 %v867_v9 }
  0x2d   :  { %358 = vmatpush.bf16.msra.mxu2 %v875_v13 }
  0x2f   :  { %203 = vmatpush.bf16.msra.mxu0 %v858_v11 }
  0x30   :  { %281 = vmatpush.bf16.msra.mxu1 %v866_v12 }
  0x31   :  { %359 = vmatpush.bf16.msra.mxu2 %v874_v16 }
  0x33   :  { %204 = vmatpush.bf16.msra.mxu0 %v857_v14 }
  0x34   :  { %282 = vmatpush.bf16.msra.mxu1 %v865_v15 }
  0x35   :  { %360 = vmatpush.bf16.msra.mxu2 %v873_v19 }
  0x37   :  { %205 = vmatpush.bf16.msra.mxu0 %v856_v17 }
  0x38   :  { %283 = vmatpush.bf16.msra.mxu1 %v864_v18 }
  0x39   :  { %361 = vmatpush.bf16.msra.mxu2 %v872_v22 }
  0x3b   :  { %206 = vmatpush.bf16.msra.mxu0 %v855_v20 }
  0x3c   :  { %284 = vmatpush.bf16.msra.mxu1 %v863_v21 }
  0x3d   :  { %362 = vmatpush.bf16.msra.mxu2 %v871_v25 }
  0x3e   :  { %207 = vmatmul.bf16.vlgmr.msra.gmra.mxu0 %v134_v23 }
  0x3f   :  { %285 = vmatmul.bf16.vlgmr.msra.gmra.mxu1 %v212_v24 }
  0x40   :  { %363 = vmatmul.bf16.vlgmr.msra.gmra.mxu2 %v290_v26 }
  0xbb   :  { %v208_v27 = vpop.f32.mrf.mxu0 }
  0xbc   :  { %v286_v28 = vpop.f32.mrf.mxu1  ;;  %v368_v30 = vmul.f32 0.088388346, %v208_v27 }
  0xbd   :  { %v370_v29 = vpack.c.bf16 %v286_v28, %v286_v28 }
  0xbe   :  { %v369_v32 = vpack.c.bf16 %v368_v30, %v368_v30 }
  0xbf   :  { %493 = vrot.lane.b32.xlu2 %v370_v29, %s1120_s15  ;;  %430 = vrot.lane.b32.xlu1 %v370_v29, %s1127_s4  ;;  %v377_v31 = vsel %vm372_vm0, %v370_v29, 0 }
  0xc0   :  { %386 = vmatpush.bf16.xpose.msra.mxu3 %v377_v31 }
  0xc3   :  { %v210_v33 = vpop.f32.mrf.mxu0  ;;  %v364_v35 = vpop.f32.mrf.mxu2 }
  0xc4   :  { %v288_v34 = vpop.f32.mrf.mxu1  ;;  %v1215_v37 = vpack.c.bf16 %v364_v35, %v364_v35 }
  0xc6   :  { %v410_v38 = vsel %vm408_vm1, %v1215_v37, 0 }
  0xc7   :  { %555 = vrot.lane.b32.xlu2 %v370_v29, %s1128_s6  ;;  %427 = vrot.lane.b32.xlu1 %v369_v32, %s1127_s4 }
  0xc8   :  { %815 = vmatmul.msk.bf16.vlgmr.msra.gmra.mxu3 %vm372_vm0, %v369_v32 }
  0xc9   :  { %419 = vmatpush.bf16.msrb.mxu3 %v410_v38 }
  0xcb   :  { %v366_v36 = vpop.f32.mrf.mxu2 }
  0xcf   :  { %553 = vrot.lane.b32.xlu1 %v369_v32, %s1128_s6 }
 0x119   :  { %v494_v39 = vpop.permute.xlu2 %493 }
 0x11a   :  { %v499_v40 = vsel %vm372_vm0, %v494_v39, 0 }
 0x11b   :  { %508 = vmatpush.bf16.xpose.msrb.mxu2 %v499_v40 }
 0x121   :  { %v556_v54 = vpop.permute.xlu2 %555 }
 0x122   :  { %v561_v56 = vsel %vm372_vm0, %v556_v54, 0  ;;  %v880_v54 = vld [vmem:[#allocation14 + $0x8] sm:$0xff] }
 0x131   :  { %v431_v41 = vpop.permute.xlu1 %430 }
 0x132   :  { %v436_v42 = vsel %vm372_vm0, %v431_v41, 0 }
 0x133   :  { %445 = vmatpush.bf16.xpose.msra.mxu3 %v436_v42 }
 0x139   :  { %v428_v58 = vpop.permute.xlu1 %427 }
 0x141   :  { %v554_v59 = vpop.permute.xlu1 %553 }
 0x14b   :  { %v388_v43 = vpop.f32.mrf.mxu3 }
 0x14c   :  { %v393_v44 = vsel %vm392_vm2, %v388_v43, -inf }
 0x14d   :  { %394 = vmax.xlane.f32.xlu0 %v393_v44 }
 0x153   :  { %v390_v45 = vpop.f32.mrf.mxu3 }
 0x1c0   :  { %v395_v46 = vpop.xlane.xlu0 %394 }
 0x1c1   :  { %v396_v47 = vsub.f32 %v388_v43, %v395_v46  ;;  %v886_v46 = vld [vmem:[#allocation14 + $0x38] sm:$0xff] }
 0x1c2   :  { %685 = vmatpush.bf16.msrb.mxu1 %v886_v46 }
 0x1c3   :  { %v397_v48 = vmul.f32 1.442695, %v396_v47  ;;  %v885_v47 = vld [vmem:[#allocation14 + $0x30] sm:$0xff] }
 0x1c5   :  { %900 = vpow2.f32 %v397_v48  ;;  %v884_v48 = vld [vmem:[#allocation14 + $0x28] sm:$0xff] }
 0x1c6   :  { %686 = vmatpush.bf16.msrb.mxu1 %v885_v47 }
 0x1ca   :  { %687 = vmatpush.bf16.msrb.mxu1 %v884_v48 }
 0x1cb   :  { %v901_v49 = vpop.eup %900 }
 0x1cc   :  { %v399_v50 = vsel %vm392_vm2, %v901_v49, 0.0 }
 0x1cd   :  { %400 = vadd.xlane.f32.xlu0 %v399_v50  ;;  %v882_v50 = vld [vmem:[#allocation14 + $0x18] sm:$0xff] }
 0x1e1   :  { %491 = vrot.lane.b32.xlu0 %v369_v32, %s1120_s15 }
 0x240   :  { %v401_v51 = vpop.xlane.xlu0 %400 }
 0x241   :  { %902 = vrcp.f32 %v401_v51  ;;  %v881_v51 = vld [vmem:[#allocation14 + $0x10] sm:$0xff] }
 0x247   :  { %v903_v52 = vpop.eup %902 }
 0x248   :  { %v403_v53 = vmul.f32 %v903_v52, %v901_v49  ;;  %v883_v49 = vld [vmem:[#allocation14 + $0x20] sm:$0xff] }
 0x249   :  { %688 = vmatpush.bf16.msrb.mxu1 %v883_v49 }
 0x24a   :  { %v404_v55 = vpack.c.bf16 %v403_v53, %v403_v53 }
 0x24c   :  { %816 = vmatmul.msk.bf16.vlgmr.msrb.gmra.mxu3 %vm392_vm2, %v404_v55  ;;  %v879_v55 = vld [vmem:[#allocation14] sm:$0xff] }
 0x24d   :  { %570 = vmatpush.bf16.xpose.msrb.mxu3 %v561_v56  ;;  %689 = vmatpush.bf16.msrb.mxu1 %v882_v50 }
 0x251   :  { %690 = vmatpush.bf16.msrb.mxu1 %v881_v51 }
 0x253   :  { %v492_v57 = vpop.permute.xlu0 %491 }
 0x254   :  { %819 = vmatmul.msk.bf16.vlgmr.msrb.gmra.mxu2 %vm372_vm0, %v492_v57 }
 0x255   :  { %691 = vmatpush.bf16.msrb.mxu1 %v880_v54 }
 0x259   :  { %692 = vmatpush.bf16.msrb.mxu1 %v879_v55 }
 0x25c   :  { %817 = vmatmul.msk.bf16.vlgmr.msra.gmra.mxu3 %vm372_vm0, %v428_v58 }
 0x26c   :  { %821 = vmatmul.msk.bf16.vlgmr.msrb.gmra.mxu3 %vm372_vm0, %v554_v59  ;;  %v899_v59 = vld [vmem:[%s1264_s7] ss:$0 sm:$0xff] }
 0x2cf   :  { %v421_v60 = vpop.f32.mrf.mxu3 }
 0x2d0   :  { %425 = vst.msk [vmem:[#allocation2] sm:$0xff] %vm372_vm0, %v421_v60 }
 0x2d7   :  { %v423_v61 = vpop.f32.mrf.mxu3  ;;  %v510_v62 = vpop.f32.mrf.mxu2 }
 0x2d8   :  { %v514_v63 = vsel %vm392_vm2, %v510_v62, -inf }
 0x2d9   :  { %515 = vmax.xlane.f32.xlu1 %v514_v63 }
 0x2df   :  { %v447_v0 = vpop.f32.mrf.mxu3  ;;  %v512_v1 = vpop.f32.mrf.mxu2 }
 0x2e0   :  { %v451_v2 = vsel %vm392_vm2, %v447_v0, -inf }
 0x2e1   :  { %452 = vmax.xlane.f32.xlu2 %v451_v2 }
 0x2e7   :  { %v449_v3 = vpop.f32.mrf.mxu3 }
 0x2ef   :  { %v572_v4 = vpop.f32.mrf.mxu3 }
 0x2f0   :  { %v576_v5 = vsel %vm392_vm2, %v572_v4, -inf }
 0x2f1   :  { %577 = vmax.xlane.f32.xlu0 %v576_v5 }
 0x2f7   :  { %v574_v6 = vpop.f32.mrf.mxu3 }
 0x305   :  { %526 = vrot.lane.b32.xlu0 %v1215_v37, %s1120_s15 }
 0x34c   :  { %v516_v7 = vpop.xlane.xlu1 %515 }
 0x34d   :  { %v517_v8 = vsub.f32 %v510_v62, %v516_v7 }
 0x34f   :  { %v518_v9 = vmul.f32 1.442695, %v517_v8 }
 0x351   :  { %904 = vpow2.f32 %v518_v9 }
 0x354   :  { %v453_v10 = vpop.xlane.xlu2 %452 }
 0x355   :  { %v454_v11 = vsub.f32 %v447_v0, %v453_v10 }
 0x357   :  { %v905_v12 = vpop.eup %904  ;;  %v455_v13 = vmul.f32 1.442695, %v454_v11 }
 0x358   :  { %v520_v14 = vsel %vm392_vm2, %v905_v12, 0.0 }
 0x359   :  { %906 = vpow2.f32 %v455_v13  ;;  %521 = vadd.xlane.f32.xlu1 %v520_v14 }
 0x35f   :  { %v907_v15 = vpop.eup %906 }
 0x360   :  { %v457_v16 = vsel %vm392_vm2, %v907_v15, 0.0 }
 0x361   :  { %458 = vadd.xlane.f32.xlu2 %v457_v16 }
 0x364   :  { %v578_v17 = vpop.xlane.xlu0 %577 }
 0x365   :  { %v579_v18 = vsub.f32 %v572_v4, %v578_v17 }
 0x367   :  { %v580_v19 = vmul.f32 1.442695, %v579_v18 }
 0x369   :  { %908 = vpow2.f32 %v580_v19 }
 0x36f   :  { %v909_v20 = vpop.eup %908 }
 0x370   :  { %v582_v21 = vsel %vm392_vm2, %v909_v20, 0.0 }
 0x371   :  { %583 = vadd.xlane.f32.xlu1 %v582_v21 }
 0x377   :  { %v527_v22 = vpop.permute.xlu0 %526 }
 0x378   :  { %v532_v23 = vsel %vm408_vm1, %v527_v22, 0 }
 0x379   :  { %464 = vrot.lane.b32.xlu2 %v1215_v37, %s1127_s4  ;;  %541 = vmatpush.bf16.msra.mxu2 %v532_v23 }
 0x38a   :  { %588 = vrot.lane.b32.xlu1 %v1215_v37, %s1128_s6 }
 0x3cc   :  { %v522_v24 = vpop.xlane.xlu1 %521 }
 0x3cd   :  { %910 = vrcp.f32 %v522_v24 }
 0x3d3   :  { %v911_v25 = vpop.eup %910 }
 0x3d4   :  { %v524_v26 = vmul.f32 %v911_v25, %v905_v12  ;;  %v459_v27 = vpop.xlane.xlu2 %458 }
 0x3d5   :  { %912 = vrcp.f32 %v459_v27 }
 0x3d6   :  { %v525_v28 = vpack.c.bf16 %v524_v26, %v524_v26 }
 0x3d8   :  { %820 = vmatmul.msk.bf16.vlgmr.msra.gmra.mxu2 %vm392_vm2, %v525_v28 }
 0x3db   :  { %v913_v29 = vpop.eup %912 }
 0x3dc   :  { %v461_v30 = vmul.f32 %v913_v29, %v907_v15  ;;  %v465_v31 = vpop.permute.xlu2 %464 }
 0x3dd   :  { %v470_v32 = vsel %vm408_vm1, %v465_v31, 0 }
 0x3de   :  { %479 = vmatpush.bf16.msrb.mxu0 %v470_v32  ;;  %v462_v33 = vpack.c.bf16 %v461_v30, %v461_v30 }
 0x3e1   :  { %818 = vmatmul.msk.bf16.vlgmr.msrb.gmra.mxu0 %vm392_vm2, %v462_v33 }
 0x3e4   :  { %v584_v34 = vpop.xlane.xlu1 %583 }
 0x3e5   :  { %914 = vrcp.f32 %v584_v34 }
 0x3eb   :  { %v915_v35 = vpop.eup %914 }
 0x3ec   :  { %v586_v36 = vmul.f32 %v915_v35, %v909_v20 }
 0x3ee   :  { %v587_v39 = vpack.c.bf16 %v586_v36, %v586_v36 }
 0x3fc   :  { %v589_v37 = vpop.permute.xlu1 %588 }
 0x3fd   :  { %v594_v38 = vsel %vm408_vm1, %v589_v37, 0 }
 0x3fe   :  { %603 = vmatpush.bf16.msra.mxu0 %v594_v38 }
 0x401   :  { %822 = vmatmul.msk.bf16.vlgmr.msra.gmra.mxu0 %vm392_vm2, %v587_v39 }
 0x45b   :  { %v543_v40 = vpop.f32.mrf.mxu2 }
 0x45e   :  { %v481_v41 = vpop.f32.mrf.mxu0 }
 0x45f   :  { %486 = vrot.lane.b32.xlu2 %v481_v41, %s1128_s6 }
 0x463   :  { %v545_v42 = vpop.f32.mrf.mxu2 }
 0x466   :  { %v483_v43 = vpop.f32.mrf.mxu0 }
 0x467   :  { %548 = vrot.lane.b32.xlu2 %v543_v40, %s1120_s15 }
 0x47e   :  { %v605_v44 = vpop.f32.mrf.mxu0 }
 0x47f   :  { %610 = vrot.lane.b32.xlu0 %v605_v44, %s1127_s4 }
 0x486   :  { %v607_v45 = vpop.f32.mrf.mxu0 }
 0x4b9   :  { %v487_v52 = vpop.permute.xlu2 %486 }
 0x4ba   :  { %490 = vst.msk [vmem:[#allocation2] sm:$0xff] %vm489_vm3, %v487_v52 }
 0x4c1   :  { %v549_v53 = vpop.permute.xlu2 %548 }
 0x4c2   :  { %552 = vst.msk [vmem:[#allocation2] sm:$0xff] %vm551_vm4, %v549_v53 }
 0x4f1   :  { %v611_v56 = vpop.permute.xlu0 %610 }
 0x4f2   :  { %614 = vst.msk [vmem:[#allocation2] sm:$0xff] %vm613_vm5, %v611_v56 }
 0x4f9   :  { %v615_v57 = vld [vmem:[#allocation2] sm:$0xff] }
 0x4fa   :  { %v616_v58 = vpack.c.bf16 %v615_v57, %v615_v57 }
 0x4fc   :  { %693 = vmatmul.bf16.vlgmr.msrb.gmra.mxu1 %v616_v58 }
 0x579   :  { %v694_v60 = vpop.f32.mrf.mxu1 }
 0x57a   :  { %v695_v61 = vadd.f32 %v899_v59, %v694_v60 }
 0x57c   :  { %698 = vst [vmem:[#allocation15] sm:$0xff] %v695_v61 }
 0x57d   :  { %709 = dma.vmem_to_hbm [thread:$0]  %s705_s17, 128, %s707_s20, [#allocation5]  }
 0x581   :  { %v696_v62 = vpop.f32.mrf.mxu1 }
 0x582   :  { %1116 = dma.done.wait [#allocation5], 128  }
 0x583   :  { %1117 = vsyncadd [#allocation5], 4294967168 }
 0x584   :  { %714 = vsyncpa [#allocation4], 1 }
 0x585   :  { %715 = vsyncpa [#allocation7], 1 }
 0x586   :  { %716 = vsyncpa [#allocation10], 1 }
 0x587   :  { %717 = vsyncpa [#allocation13], 1 }
 0x588   :  { %718 = vsyncpa [#allocation5], 1 }

</bundles_post_ra>
